<compile_context>
chip_gen: v7x
topology: tpu7x:2x2x1
jax: 0.10.0
libtpu: 0.0.40
codegen_flags: <defaults>
</compile_context>

<pallas_src>
import functools

import jax
import jax.numpy as jnp
from jax.experimental import pallas as pl
from jax.experimental.pallas import tpu as pltpu


def _round_up(x, m):
    return ((x + m - 1) // m) * m


def _qfunc_kernel(x_ref, w1_ref, b1_ref, w2_ref, b2_ref, w3_ref, b3_ref,
                  out_ref):
    # Feature-major: x_ref is (in_dim, tm); weights are (out, in); all matmuls
    # accumulate in f32 on the MXU, bias/ReLU run in f32 on the VPU.
    x = x_ref[...]                                            # (in_dim, tm)

    # Layer 1: h1^T = relu(W1 @ x^T + b1)     -> (hid1, tm)
    h1 = jnp.dot(w1_ref[...], x, preferred_element_type=jnp.float32)
    h1 = jnp.maximum(h1 + b1_ref[...], 0.0)

    # Layer 2: h2^T = relu(W2 @ h1^T + b2)    -> (hid2, tm)
    h2 = jnp.dot(w2_ref[...], h1.astype(w2_ref.dtype),
                 preferred_element_type=jnp.float32)
    h2 = jnp.maximum(h2 + b2_ref[...], 0.0)

    # Layer 3: q^T = W3 @ h2^T + b3           -> (1, tm)   (lane-dense output)
    q = jnp.dot(w3_ref[...], h2.astype(w3_ref.dtype),
                preferred_element_type=jnp.float32) + b3_ref[...]

    out_ref[...] = q.astype(out_ref.dtype)


@functools.partial(jax.jit, static_argnames=("tile_m", "compute_dtype"))
def fully_connected_q_function(observations, actions, params, *,
                               tile_m=1024, compute_dtype=jnp.bfloat16):
    """Pallas-backed forward pass. Returns q-values of shape (B,).

    tile_m: batch-tile cap (rounded to a multiple of 128 lanes).  Default 1024
            fits all generations comfortably; the tile is additionally capped
            so the batch grid has at least 2 steps when B > 128.
    compute_dtype: jnp.bfloat16 (default; native MXU path, f32 accumulation)
            or jnp.float32 (exact).
    """
    w1, b1, w2, b2, w3, b3 = params
    B, obs_dim = observations.shape
    act_dim = actions.shape[1]
    in_dim = obs_dim + act_dim
    hid1 = w1.shape[0]
    hid2 = w2.shape[0]

    # Batch tile: multiple of 128 lanes, >= 2 grid steps when possible.
    tm = max(128, min(_round_up(int(tile_m), 128),
                      _round_up(B, 128),
                      _round_up((B + 1) // 2, 128)))
    b_pad = _round_up(B, tm)
    grid = (b_pad // tm,)

    # Wrapper-side transform (single fused XLA pass): concat obs/act, go
    # feature-major (in_dim, B), pad the batch to a tile multiple, and cast to
    # the compute dtype so the kernel DMAs the narrow dtype directly.
    x = jnp.concatenate([observations, actions], axis=1).T      # (in_dim, B)
    if b_pad != B:
        x = jnp.pad(x, ((0, 0), (0, b_pad - B)))
    x = x.astype(compute_dtype)

    w1c = w1.astype(compute_dtype)
    w2c = w2.astype(compute_dtype)
    w3c = w3.astype(compute_dtype)
    b1c = b1.reshape(hid1, 1).astype(jnp.float32)
    b2c = b2.reshape(hid2, 1).astype(jnp.float32)
    b3c = b3.reshape(1, 1).astype(jnp.float32)

    q = pl.pallas_call(
        _qfunc_kernel,
        out_shape=jax.ShapeDtypeStruct((1, b_pad), jnp.float32),
        grid_spec=pltpu.PrefetchScalarGridSpec(
            num_scalar_prefetch=0,
            grid=grid,
            in_specs=[
                # Activation tile: pipelined over the batch grid (lane axis).
                pl.BlockSpec((in_dim, tm), lambda i: (0, i)),
                # Weights / biases: same block every step -> resident in VMEM.
                pl.BlockSpec((hid1, in_dim), lambda i: (0, 0)),
                pl.BlockSpec((hid1, 1), lambda i: (0, 0)),
                pl.BlockSpec((hid2, hid1), lambda i: (0, 0)),
                pl.BlockSpec((hid2, 1), lambda i: (0, 0)),
                pl.BlockSpec((1, hid2), lambda i: (0, 0)),
                pl.BlockSpec((1, 1), lambda i: (0, 0)),
            ],
            # Lane-dense output block: (1, tm), contiguous writeback.
            out_specs=pl.BlockSpec((1, tm), lambda i: (0, i)),
        ),
        compiler_params=pltpu.CompilerParams(
            dimension_semantics=("parallel",),
        ),
    )(x, w1c, b1c, w2c, b2c, w3c, b3c)

    # Drop batch padding and squeeze — glue, done outside the kernel.
    return q[0, :B]


def init_params(key, observation_dim, action_dim, arch='256-256'):
    """Deterministic init matching torch.nn.Linear defaults, torch layout.

    Weights are stored as (out_features, in_features), biases as (out_features,),
    exactly like torch.nn.Linear — the feature-major kernel uses them as-is.
    """
    hidden_sizes = [int(h) for h in arch.split('-')]
    dims = [observation_dim + action_dim] + hidden_sizes + [1]
    params = []
    for i in range(len(dims) - 1):
        d_in, d_out = dims[i], dims[i + 1]
        key, kw, kb = jax.random.split(key, 3)
        bound = 1.0 / jnp.sqrt(jnp.float32(d_in))
        w = jax.random.uniform(kw, (d_out, d_in), jnp.float32, -bound, bound)
        b = jax.random.uniform(kb, (d_out,), jnp.float32, -bound, bound)
        params.extend([w, b])
    return tuple(params)


def reference_forward(observations, actions, params):
    """Pure-JAX reference (torch semantics) for correctness checking."""
    w1, b1, w2, b2, w3, b3 = params
    x = jnp.concatenate([observations, actions], axis=1)
    h1 = jnp.maximum(x @ w1.T + b1, 0.0)
    h2 = jnp.maximum(h1 @ w2.T + b2, 0.0)
    q = h2 @ w3.T + b3
    return jnp.squeeze(q, axis=1)


if __name__ == "__main__":
    key = jax.random.PRNGKey(0)

    observation_dim = 17
    action_dim = 7
    arch = '256-256'

    key, k_par = jax.random.split(key)
    params = init_params(k_par, observation_dim, action_dim, arch)

    # --- case 1: small batch, exact f32 path ---
    batch = 8
    key, k_obs, k_act = jax.random.split(key, 3)
    observations = jax.random.normal(k_obs, (batch, observation_dim), jnp.float32)
    actions = jax.random.normal(k_act, (batch, action_dim), jnp.float32)

    q_f32 = jax.block_until_ready(
        fully_connected_q_function(observations, actions, params,
                                   compute_dtype=jnp.float32))
    q_ref = reference_forward(observations, actions, params)
    assert q_f32.shape == (batch,)
    assert jnp.allclose(q_f32, q_ref, atol=1e-5, rtol=1e-5), (
        f"f32 mismatch: {q_f32} vs {q_ref}")

    # --- case 2: default bf16 path (f32 accumulation, looser tolerance) ---
    q_bf16 = jax.block_until_ready(
        fully_connected_q_function(observations, actions, params))
    assert q_bf16.shape == (batch,)
    assert jnp.allclose(q_bf16, q_ref, atol=5e-2, rtol=5e-2), "bf16 mismatch"

    # --- case 3: non-multiple batch exercising grid > 1 + padded tail ---
    batch2 = 300
    key, k_obs2, k_act2 = jax.random.split(key, 3)
    obs2 = jax.random.normal(k_obs2, (batch2, observation_dim), jnp.float32)
    act2 = jax.random.normal(k_act2, (batch2, action_dim), jnp.float32)

    q2 = jax.block_until_ready(
        fully_connected_q_function(obs2, act2, params, tile_m=256,
                                   compute_dtype=jnp.float32))
    q2_ref = reference_forward(obs2, act2, params)
    assert q2.shape == (batch2,)
    assert jnp.allclose(q2, q2_ref, atol=1e-5, rtol=1e-5), "grid/tail mismatch"

    print("KERNEL_OK")
</pallas_src>

<mosaic_0001>
module attributes {stable_mosaic.version = 11 : i64} {
  func.func @_qfunc_kernel(%arg0: i32, %arg1: memref<24x128xf32, #tpu.memory_space<vmem>>, %arg2: memref<256x24xf32, #tpu.memory_space<vmem>>, %arg3: memref<256x1xf32, #tpu.memory_space<vmem>>, %arg4: memref<256x256xf32, #tpu.memory_space<vmem>>, %arg5: memref<256x1xf32, #tpu.memory_space<vmem>>, %arg6: memref<1x256xf32, #tpu.memory_space<vmem>>, %arg7: memref<1x1xf32, #tpu.memory_space<vmem>>, %arg8: memref<1x128xf32, #tpu.memory_space<vmem>>) attributes {dimension_semantics = [#tpu.dimension_semantics<parallel>], iteration_bounds = array<i64: 1>, scalar_prefetch = 0 : i64, scratch_operands = 0 : i64, tpu.core_type = #tpu.core_type<tc>, window_params = [{transform_indices = @transform_0, window_bounds = array<i64: 24, 128>}, {pipeline_mode = #tpu.pipeline_mode<synchronous>, transform_indices = @transform_1, window_bounds = array<i64: 256, 24>}, {pipeline_mode = #tpu.pipeline_mode<synchronous>, transform_indices = @transform_2, window_bounds = array<i64: 256, 1>}, {pipeline_mode = #tpu.pipeline_mode<synchronous>, transform_indices = @transform_3, window_bounds = array<i64: 256, 256>}, {pipeline_mode = #tpu.pipeline_mode<synchronous>, transform_indices = @transform_4, window_bounds = array<i64: 256, 1>}, {pipeline_mode = #tpu.pipeline_mode<synchronous>, transform_indices = @transform_5, window_bounds = array<i64: 1, 256>}, {pipeline_mode = #tpu.pipeline_mode<synchronous>, transform_indices = @transform_6, window_bounds = array<i64: 1, 1>}, {transform_indices = @transform_7, window_bounds = array<i64: 1, 128>}]} {
    %c0 = arith.constant 0 : index
    %c0_0 = arith.constant 0 : index
    %0 = vector.load %arg1[%c0, %c0_0] : memref<24x128xf32, #tpu.memory_space<vmem>>, vector<24x128xf32>
    %c0_1 = arith.constant 0 : index
    %c0_2 = arith.constant 0 : index
    %1 = vector.load %arg2[%c0_1, %c0_2] : memref<256x24xf32, #tpu.memory_space<vmem>>, vector<256x24xf32>
    %cst = arith.constant dense<0.000000e+00> : vector<256x128xf32>
    %2 = tpu.matmul %1, %0, %cst {dimension_numbers = #tpu.dot_dimension_numbers<[1], [0], [0], [1], [0, 0, 1, 1], [], []>} : vector<256x24xf32>, vector<24x128xf32>, vector<256x128xf32> -> vector<256x128xf32>
    %c0_3 = arith.constant 0 : index
    %c0_4 = arith.constant 0 : index
    %3 = vector.load %arg3[%c0_3, %c0_4] : memref<256x1xf32, #tpu.memory_space<vmem>>, vector<256x1xf32>
    %4 = vector.broadcast %3 : vector<256x1xf32> to vector<256x128xf32>
    %5 = arith.addf %2, %4 : vector<256x128xf32>
    %cst_5 = arith.constant 0.000000e+00 : f32
    %6 = vector.broadcast %cst_5 : f32 to vector<256x128xf32>
    %7 = arith.maximumf %5, %6 : vector<256x128xf32>
    %c0_6 = arith.constant 0 : index
    %c0_7 = arith.constant 0 : index
    %8 = vector.load %arg4[%c0_6, %c0_7] : memref<256x256xf32, #tpu.memory_space<vmem>>, vector<256x256xf32>
    %cst_8 = arith.constant dense<0.000000e+00> : vector<256x128xf32>
    %9 = tpu.matmul %8, %7, %cst_8 {dimension_numbers = #tpu.dot_dimension_numbers<[1], [0], [0], [1], [0, 0, 1, 1], [], []>} : vector<256x256xf32>, vector<256x128xf32>, vector<256x128xf32> -> vector<256x128xf32>
    %c0_9 = arith.constant 0 : index
    %c0_10 = arith.constant 0 : index
    %10 = vector.load %arg5[%c0_9, %c0_10] : memref<256x1xf32, #tpu.memory_space<vmem>>, vector<256x1xf32>
    %11 = vector.broadcast %10 : vector<256x1xf32> to vector<256x128xf32>
    %12 = arith.addf %9, %11 : vector<256x128xf32>
    %cst_11 = arith.constant 0.000000e+00 : f32
    %13 = vector.broadcast %cst_11 : f32 to vector<256x128xf32>
    %14 = arith.maximumf %12, %13 : vector<256x128xf32>
    %c0_12 = arith.constant 0 : index
    %c0_13 = arith.constant 0 : index
    %15 = vector.load %arg6[%c0_12, %c0_13] : memref<1x256xf32, #tpu.memory_space<vmem>>, vector<1x256xf32>
    %cst_14 = arith.constant dense<0.000000e+00> : vector<1x128xf32>
    %16 = tpu.matmul %15, %14, %cst_14 {dimension_numbers = #tpu.dot_dimension_numbers<[1], [0], [0], [1], [0, 0, 1, 1], [], []>} : vector<1x256xf32>, vector<256x128xf32>, vector<1x128xf32> -> vector<1x128xf32>
    %c0_15 = arith.constant 0 : index
    %c0_16 = arith.constant 0 : index
    %17 = vector.load %arg7[%c0_15, %c0_16] : memref<1x1xf32, #tpu.memory_space<vmem>>, vector<1x1xf32>
    %18 = vector.broadcast %17 : vector<1x1xf32> to vector<1x128xf32>
    %19 = arith.addf %16, %18 : vector<1x128xf32>
    %c0_17 = arith.constant 0 : index
    %c0_18 = arith.constant 0 : index
    %20 = vector.load %arg8[%c0_17, %c0_18] : memref<1x128xf32, #tpu.memory_space<vmem>>, vector<1x128xf32>
    tpu.vector_store %arg8[%c0_17, %c0_18], %19 {strides = array<i32>} : memref<1x128xf32, #tpu.memory_space<vmem>>, vector<1x128xf32>,
    return
  }
  func.func @transform_0(%arg0: i32) -> (i32, i32) {
    %c0_i32 = arith.constant 0 : i32
    %c0_i32_0 = arith.constant 0 : i32
    return %c0_i32, %arg0 : i32, i32
  }
  func.func @transform_1(%arg0: i32) -> (i32, i32) {
    %c0_i32 = arith.constant 0 : i32
    %c0_i32_0 = arith.constant 0 : i32
    %c0_i32_1 = arith.constant 0 : i32
    return %c0_i32, %c0_i32_0 : i32, i32
  }
  func.func @transform_2(%arg0: i32) -> (i32, i32) {
    %c0_i32 = arith.constant 0 : i32
    %c0_i32_0 = arith.constant 0 : i32
    %c0_i32_1 = arith.constant 0 : i32
    return %c0_i32, %c0_i32_0 : i32, i32
  }
  func.func @transform_3(%arg0: i32) -> (i32, i32) {
    %c0_i32 = arith.constant 0 : i32
    %c0_i32_0 = arith.constant 0 : i32
    %c0_i32_1 = arith.constant 0 : i32
    return %c0_i32, %c0_i32_0 : i32, i32
  }
  func.func @transform_4(%arg0: i32) -> (i32, i32) {
    %c0_i32 = arith.constant 0 : i32
    %c0_i32_0 = arith.constant 0 : i32
    %c0_i32_1 = arith.constant 0 : i32
    return %c0_i32, %c0_i32_0 : i32, i32
  }
  func.func @transform_5(%arg0: i32) -> (i32, i32) {
    %c0_i32 = arith.constant 0 : i32
    %c0_i32_0 = arith.constant 0 : i32
    %c0_i32_1 = arith.constant 0 : i32
    return %c0_i32, %c0_i32_0 : i32, i32
  }
  func.func @transform_6(%arg0: i32) -> (i32, i32) {
    %c0_i32 = arith.constant 0 : i32
    %c0_i32_0 = arith.constant 0 : i32
    %c0_i32_1 = arith.constant 0 : i32
    return %c0_i32, %c0_i32_0 : i32, i32
  }
  func.func @transform_7(%arg0: i32) -> (i32, i32) {
    %c0_i32 = arith.constant 0 : i32
    %c0_i32_0 = arith.constant 0 : i32
    return %c0_i32, %arg0 : i32, i32
  }
}

</mosaic_0001>

<bundles_post_ra>
// kernel: fully_connected_q_function.1
= control target key start
LH: loop header
LB: loop body
LE: loop exit
PB: predicated region body
PF: predicated region fallthrough
CT: control target
= control target key end

     0   :  { %v1495_v0 = vmov 0   ;;  %vm255_vm0 = vcmask 195584   ;;  %s2185_s2 = inlined_call_operand.vmem [shape: f32[256,1], index: 2, kind: input, shape index: {}]   ;;  %s2186_s0 = inlined_call_operand.vmem [shape: f32[24,128], index: 0, kind: input, shape index: {}]   ;;  %s2187_s1 = inlined_call_operand.vmem [shape: f32[256,24], index: 1, kind: input, shape index: {}]   ;;  %s2188_s6 = inlined_call_operand.<no memory space> [shape: f32[1,1], index: 6, kind: input, shape index: {}]   ;;  %s2189_s4 = inlined_call_operand.vmem [shape: f32[256,1], index: 4, kind: input, shape index: {}]   ;;  %s2190_s3 = inlined_call_operand.vmem [shape: f32[256,256], index: 3, kind: input, shape index: {}]   ;;  %s2191_s5 = inlined_call_operand.vmem [shape: f32[1,256], index: 5, kind: input, shape index: {}]   ;;  %s2192_s7 = inlined_call_operand.vmem [shape: f32[1,128], index: 7, kind: output, shape index: {}]  }
   0x1   :  { %1494 = vset.pattern.permute.xlu1 %v1495_v0  ;;  %1493 = vset.pattern.permute.xlu0 %v1495_v0  ;;  %v65_v1 = vld [vmem:[%s2185_s2 + $0x10] sm:$0xff]  ;;  %v63_v2 = vld [vmem:[%s2185_s2] sm:$0xff]  ;;  %v12_v4 = vstv %s2188_s6  ;;  %v29_v5 = vld [vmem:[%s2186_s0 + $0x8] sm:$0xff] }
   0x2   :  { %v28_v3 = vld [vmem:[%s2186_s0] sm:$0xff]  ;;  %107 = vperm.xlu1 %1494, %v65_v1   ;;  %97 = vperm.xlu0 %1493, %v63_v2   ;;  %13 = vst [vmem:[#allocation2] sm:$0x1] %v12_v4  ;;  %v66_v7 = vld [vmem:[%s2185_s2 + $0x18] sm:$0xff]  ;;  %v64_v9 = vld [vmem:[%s2185_s2 + $0x8] sm:$0xff] }
   0x3   :  { %v1375_v6 = vpack.c.bf16 %v29_v5, %v28_v3  ;;  %v31_v8 = vld [vmem:[%s2187_s1] sm:$0xff]  ;;  %v30_v10 = vld [vmem:[%s2186_s0 + $0x10] sm:$0xff]  ;;  %v68_v11 = vld [vmem:[%s2185_s2 + $0x28] sm:$0xff] }
   0x4   :  { %1327 = vmatprep.mubr.msk.f32.mxu0 %vm255_vm0, %v31_v8  ;;  %v67_v12 = vld [vmem:[%s2185_s2 + $0x20] sm:$0xff]  ;;  %v32_v13 = vld [vmem:[%s2187_s1 + $0x8] sm:$0xff]  ;;  %v33_v14 = vld [vmem:[%s2187_s1 + $0x10] sm:$0xff] }
   0x5   :  { %1376 = vmatprep.subr.bf16.mxu0 %v1375_v6  ;;  %v70_v15 = vld [vmem:[%s2185_s2 + $0x38] sm:$0xff]  ;;  %v69_v16 = vld [vmem:[%s2185_s2 + $0x30] sm:$0xff]  ;;  %v35_v18 = vld [vmem:[%s2187_s1 + $0x20] sm:$0xff] }
   0x6   :  { %1378 = vmatpush3.bf16.msra.mxu0 %v1375_v6  ;;  %112 = vperm.xlu1 %1494, %v66_v7   ;;  %v34_v17 = vld [vmem:[%s2187_s1 + $0x18] sm:$0xff]  ;;  %v72_v19 = vld [vmem:[%s2185_s2 + $0x48] sm:$0xff]  ;;  %v71_v20 = vld [vmem:[%s2185_s2 + $0x40] sm:$0xff] }
   0x7   :  { %102 = vperm.xlu0 %1493, %v64_v9   ;;  %1325 = vmatprep.subr.mxu0 %v30_v10  ;;  %v36_v21 = vld [vmem:[%s2187_s1 + $0x28] sm:$0xff]  ;;  %v37_v22 = vld [vmem:[%s2187_s1 + $0x30] sm:$0xff]  ;;  %v74_v23 = vld [vmem:[%s2185_s2 + $0x58] sm:$0xff] }
   0x8   :  { %v73_v24 = vld [vmem:[%s2185_s2 + $0x50] sm:$0xff]  ;;  %v38_v25 = vld [vmem:[%s2187_s1 + $0x38] sm:$0xff]  ;;  %v39_v26 = vld [vmem:[%s2187_s1 + $0x40] sm:$0xff] }
   0x9   :  { %v76_v27 = vld [vmem:[%s2185_s2 + $0x68] sm:$0xff]  ;;  %v75_v28 = vld [vmem:[%s2185_s2 + $0x60] sm:$0xff]  ;;  %v41_v30 = vld [vmem:[%s2187_s1 + $0x50] sm:$0xff] }
   0xa   :  { %1326 = vmatpush3.msra.mxu0 %v30_v10  ;;  %122 = vperm.xlu1 %1494, %v68_v11   ;;  %v40_v29 = vld [vmem:[%s2187_s1 + $0x48] sm:$0xff]  ;;  %v78_v31 = vld [vmem:[%s2185_s2 + $0x78] sm:$0xff]  ;;  %v77_v32 = vld [vmem:[%s2185_s2 + $0x70] sm:$0xff] }
   0xb   :  { %117 = vperm.xlu0 %1493, %v67_v12   ;;  %1328 = vmatmul.mubr.msk.f32.vlgmr.msra.gmra.mrb[0].mxu0 %vm255_vm0, %v32_v13  ;;  %v42_v33 = vld [vmem:[%s2187_s1 + $0x58] sm:$0xff]  ;;  %v43_v34 = vld [vmem:[%s2187_s1 + $0x60] sm:$0xff]  ;;  %v80_v35 = vld [vmem:[%s2185_s2 + $0x88] sm:$0xff] }
   0xc   :  { %1330 = vmatprep.mubr.msk.f32.mxu0 %vm255_vm0, %v33_v14  ;;  %v79_v36 = vld [vmem:[%s2185_s2 + $0x80] sm:$0xff]  ;;  %v44_v37 = vld [vmem:[%s2187_s1 + $0x68] sm:$0xff]  ;;  %v45_v38 = vld [vmem:[%s2187_s1 + $0x70] sm:$0xff] }
   0xd   :  { %v82_v39 = vld [vmem:[%s2185_s2 + $0x98] sm:$0xff]  ;;  %v81_v40 = vld [vmem:[%s2185_s2 + $0x90] sm:$0xff]  ;;  %v47_v42 = vld [vmem:[%s2187_s1 + $0x80] sm:$0xff] }
   0xe   :  { %132 = vperm.xlu1 %1494, %v70_v15   ;;  %v46_v41 = vld [vmem:[%s2187_s1 + $0x78] sm:$0xff]  ;;  %v84_v43 = vld [vmem:[%s2185_s2 + $0xa8] sm:$0xff]  ;;  %v83_v44 = vld [vmem:[%s2185_s2 + $0xa0] sm:$0xff] }
   0xf   :  { %127 = vperm.xlu0 %1493, %v69_v16   ;;  %1331 = vmatmul.mubr.msk.f32.gmra.mrb[2].mxu0 %vm255_vm0, %v34_v17  ;;  %v48_v45 = vld [vmem:[%s2187_s1 + $0x88] sm:$0xff]  ;;  %v49_v46 = vld [vmem:[%s2187_s1 + $0x90] sm:$0xff]  ;;  %v86_v47 = vld [vmem:[%s2185_s2 + $0xb8] sm:$0xff] }
  0x10   :  { %1333 = vmatprep.mubr.msk.f32.mxu0 %vm255_vm0, %v35_v18  ;;  %v85_v48 = vld [vmem:[%s2185_s2 + $0xb0] sm:$0xff]  ;;  %v50_v49 = vld [vmem:[%s2187_s1 + $0x98] sm:$0xff]  ;;  %v51_v50 = vld [vmem:[%s2187_s1 + $0xa0] sm:$0xff] }
  0x11   :  { %v88_v51 = vld [vmem:[%s2185_s2 + $0xc8] sm:$0xff]  ;;  %v87_v52 = vld [vmem:[%s2185_s2 + $0xc0] sm:$0xff]  ;;  %v53_v54 = vld [vmem:[%s2187_s1 + $0xb0] sm:$0xff] }
  0x12   :  { %142 = vperm.xlu1 %1494, %v72_v19   ;;  %v52_v53 = vld [vmem:[%s2187_s1 + $0xa8] sm:$0xff]  ;;  %v90_v55 = vld [vmem:[%s2185_s2 + $0xd8] sm:$0xff]  ;;  %v89_v56 = vld [vmem:[%s2185_s2 + $0xd0] sm:$0xff] }
  0x13   :  { %137 = vperm.xlu0 %1493, %v71_v20   ;;  %1334 = vmatmul.mubr.msk.f32.gmra.mrb[4].mxu0 %vm255_vm0, %v36_v21  ;;  %v54_v57 = vld [vmem:[%s2187_s1 + $0xb8] sm:$0xff]  ;;  %v55_v58 = vld [vmem:[%s2187_s1 + $0xc0] sm:$0xff]  ;;  %v92_v59 = vld [vmem:[%s2185_s2 + $0xe8] sm:$0xff] }
  0x14   :  { %1336 = vmatprep.mubr.msk.f32.mxu0 %vm255_vm0, %v37_v22  ;;  %v91_v60 = vld [vmem:[%s2185_s2 + $0xe0] sm:$0xff]  ;;  %v56_v61 = vld [vmem:[%s2187_s1 + $0xc8] sm:$0xff]  ;;  %v57_v62 = vld [vmem:[%s2187_s1 + $0xd0] sm:$0xff] }
  0x15   :  { %v94_v63 = vld [vmem:[%s2185_s2 + $0xf8] sm:$0xff]  ;;  %v93_v0 = vld [vmem:[%s2185_s2 + $0xf0] sm:$0xff]  ;;  %v59_v2 = vld [vmem:[%s2187_s1 + $0xe0] sm:$0xff] }
  0x16   :  { %152 = vperm.xlu1 %1494, %v74_v23   ;;  %v58_v1 = vld [vmem:[%s2187_s1 + $0xd8] sm:$0xff]  ;;  %v690_v3 = vld [vmem:[%s2189_s4 + $0x88] sm:$0xff]  ;;  %v689_v4 = vld [vmem:[%s2189_s4 + $0x80] sm:$0xff] }
  0x17   :  { %147 = vperm.xlu0 %1493, %v73_v24   ;;  %1337 = vmatmul.mubr.msk.f32.gmra.mrb[6].mxu0 %vm255_vm0, %v38_v25  ;;  %v60_v5 = vld [vmem:[%s2187_s1 + $0xe8] sm:$0xff]  ;;  %v61_v6 = vld [vmem:[%s2187_s1 + $0xf0] sm:$0xff]  ;;  %v673_v8 = vld [vmem:[%s2189_s4] sm:$0xff] }
  0x18   :  { %1339 = vmatprep.mubr.msk.f32.mxu0 %vm255_vm0, %v39_v26  ;;  %v674_v7 = vld [vmem:[%s2189_s4 + $0x8] sm:$0xff]  ;;  %v62_v9 = vld [vmem:[%s2187_s1 + $0xf8] sm:$0xff]  ;;  %v691_v11 = vld [vmem:[%s2189_s4 + $0x90] sm:$0xff]  ;;  %v1496_v26 = vmov 0.0|0.0  }
  0x19   :  { %v692_v10 = vld [vmem:[%s2189_s4 + $0x98] sm:$0xff]  ;;  %v675_v13 = vld [vmem:[%s2189_s4 + $0x10] sm:$0xff]  ;;  %v694_v14 = vld [vmem:[%s2189_s4 + $0xa8] sm:$0xff]  ;;  %1379 = vmatprep.subr.bf16.mxu0 %v1496_v26  ;;  %1459 = vmatprep.subr.bf16.mxu1 %v1496_v26 }
  0x1a   :  { %162 = vperm.xlu1 %1494, %v76_v27   ;;  %v676_v12 = vld [vmem:[%s2189_s4 + $0x18] sm:$0xff]  ;;  %v693_v15 = vld [vmem:[%s2189_s4 + $0xa0] sm:$0xff]  ;;  %v678_v16 = vld [vmem:[%s2189_s4 + $0x28] sm:$0xff] }
  0x1b   :  { %157 = vperm.xlu0 %1493, %v75_v28   ;;  %1340 = vmatmul.mubr.msk.f32.gmra.mrb[8].mxu0 %vm255_vm0, %v40_v29  ;;  %v677_v17 = vld [vmem:[%s2189_s4 + $0x20] sm:$0xff]  ;;  %v696_v18 = vld [vmem:[%s2189_s4 + $0xb8] sm:$0xff]  ;;  %v695_v19 = vld [vmem:[%s2189_s4 + $0xb0] sm:$0xff] }
  0x1c   :  { %1342 = vmatprep.mubr.msk.f32.mxu0 %vm255_vm0, %v41_v30  ;;  %v680_v20 = vld [vmem:[%s2189_s4 + $0x38] sm:$0xff]  ;;  %v679_v21 = vld [vmem:[%s2189_s4 + $0x30] sm:$0xff]  ;;  %v698_v22 = vld [vmem:[%s2189_s4 + $0xc8] sm:$0xff] }
  0x1d   :  { %v697_v23 = vld [vmem:[%s2189_s4 + $0xc0] sm:$0xff]  ;;  %v682_v24 = vld [vmem:[%s2189_s4 + $0x48] sm:$0xff]  ;;  %v700_v27 = vld [vmem:[%s2189_s4 + $0xd8] sm:$0xff] }
  0x1e   :  { %172 = vperm.xlu1 %1494, %v78_v31   ;;  %v681_v25 = vld [vmem:[%s2189_s4 + $0x40] sm:$0xff]  ;;  %v699_v28 = vld [vmem:[%s2189_s4 + $0xd0] sm:$0xff]  ;;  %v684_v29 = vld [vmem:[%s2189_s4 + $0x58] sm:$0xff] }
  0x1f   :  { %167 = vperm.xlu0 %1493, %v77_v32   ;;  %1343 = vmatmul.mubr.msk.f32.gmra.mrb[10].mxu0 %vm255_vm0, %v42_v33  ;;  %v683_v30 = vld [vmem:[%s2189_s4 + $0x50] sm:$0xff]  ;;  %v702_v31 = vld [vmem:[%s2189_s4 + $0xe8] sm:$0xff]  ;;  %v701_v32 = vld [vmem:[%s2189_s4 + $0xe0] sm:$0xff] }
  0x20   :  { %1345 = vmatprep.mubr.msk.f32.mxu0 %vm255_vm0, %v43_v34  ;;  %v686_v33 = vld [vmem:[%s2189_s4 + $0x68] sm:$0xff]  ;;  %v685_v34 = vld [vmem:[%s2189_s4 + $0x60] sm:$0xff] }
  0x22   :  { %182 = vperm.xlu1 %1494, %v80_v35   ;;  %v704_v35 = vld [vmem:[%s2189_s4 + $0xf8] sm:$0xff] }
  0x23   :  { %177 = vperm.xlu0 %1493, %v79_v36   ;;  %1346 = vmatmul.mubr.msk.f32.gmra.mrb[12].mxu0 %vm255_vm0, %v44_v37  ;;  %v703_v36 = vld [vmem:[%s2189_s4 + $0xf0] sm:$0xff]  ;;  %v688_v37 = vld [vmem:[%s2189_s4 + $0x78] sm:$0xff] }
  0x24   :  { %1348 = vmatprep.mubr.msk.f32.mxu0 %vm255_vm0, %v45_v38  ;;  %v687_v38 = vld [vmem:[%s2189_s4 + $0x70] sm:$0xff] }
  0x26   :  { %192 = vperm.xlu1 %1494, %v82_v39   ;;  %v1123_v39 = vld [vmem:[#allocation2] sm:$0x1] }
  0x27   :  { %187 = vperm.xlu0 %1493, %v81_v40   ;;  %1349 = vmatmul.mubr.msk.f32.gmra.mrb[14].mxu0 %vm255_vm0, %v46_v41  ;;  %v610_v40 = vld [vmem:[%s2190_s3 + $0x8] sm:$0xff] }
  0x28   :  { %1351 = vmatprep.mubr.msk.f32.mxu0 %vm255_vm0, %v47_v42  ;;  %v638_v41 = vld [vmem:[%s2190_s3 + $0xe8] sm:$0xff] }
  0x29   :  { %999 = vmatprep.mubr.f32.mxu1 %v638_v41 }
  0x2a   :  { %202 = vperm.xlu1 %1494, %v84_v43  }
  0x2b   :  { %197 = vperm.xlu0 %1493, %v83_v44   ;;  %1352 = vmatmul.mubr.msk.f32.gmra.mrb[16].mxu0 %vm255_vm0, %v48_v45 }
  0x2c   :  { %1354 = vmatprep.mubr.msk.f32.mxu0 %vm255_vm0, %v49_v46 }
  0x2e   :  { %212 = vperm.xlu1 %1494, %v86_v47  }
  0x2f   :  { %207 = vperm.xlu0 %1493, %v85_v48   ;;  %1355 = vmatmul.mubr.msk.f32.gmra.mrb[18].mxu0 %vm255_vm0, %v50_v49 }
  0x30   :  { %1357 = vmatprep.mubr.msk.f32.mxu0 %vm255_vm0, %v51_v50 }
  0x32   :  { %222 = vperm.xlu1 %1494, %v88_v51  }
  0x33   :  { %217 = vperm.xlu0 %1493, %v87_v52   ;;  %1358 = vmatmul.mubr.msk.f32.gmra.mrb[20].mxu0 %vm255_vm0, %v52_v53 }
  0x34   :  { %1360 = vmatprep.mubr.msk.f32.mxu0 %vm255_vm0, %v53_v54 }
  0x36   :  { %232 = vperm.xlu1 %1494, %v90_v55  }
  0x37   :  { %227 = vperm.xlu0 %1493, %v89_v56   ;;  %1361 = vmatmul.mubr.msk.f32.gmra.mrb[22].mxu0 %vm255_vm0, %v54_v57 }
  0x38   :  { %1363 = vmatprep.mubr.msk.f32.mxu0 %vm255_vm0, %v55_v58 }
  0x3a   :  { %242 = vperm.xlu1 %1494, %v92_v59  }
  0x3b   :  { %237 = vperm.xlu0 %1493, %v91_v60   ;;  %1364 = vmatmul.mubr.msk.f32.gmra.mrb[24].mxu0 %vm255_vm0, %v56_v61 }
  0x3c   :  { %1366 = vmatprep.mubr.msk.f32.mxu0 %vm255_vm0, %v57_v62 }
  0x3e   :  { %252 = vperm.xlu1 %1494, %v94_v63  }
  0x3f   :  { %247 = vperm.xlu0 %1493, %v93_v0   ;;  %1367 = vmatmul.mubr.msk.f32.gmra.mrb[26].mxu0 %vm255_vm0, %v58_v1 }
  0x40   :  { %1369 = vmatprep.mubr.msk.f32.mxu0 %vm255_vm0, %v59_v2 }
  0x42   :  { %792 = vperm.xlu1 %1494, %v690_v3  }
  0x43   :  { %787 = vperm.xlu0 %1493, %v689_v4   ;;  %1370 = vmatmul.mubr.msk.f32.gmra.mrb[28].mxu0 %vm255_vm0, %v60_v5 }
  0x44   :  { %1372 = vmatprep.mubr.msk.f32.mxu0 %vm255_vm0, %v61_v6 }
  0x46   :  { %712 = vperm.xlu1 %1494, %v674_v7  }
  0x47   :  { %707 = vperm.xlu0 %1493, %v673_v8   ;;  %1373 = vmatmul.mubr.msk.f32.gmra.mrb[30].mxu0 %vm255_vm0, %v62_v9 }
  0x48   :  { %929 = vmatprep.mubr.f32.mxu0 %v610_v40 }
  0x4a   :  { %802 = vperm.xlu1 %1494, %v692_v10  }
  0x4b   :  { %797 = vperm.xlu0 %1493, %v691_v11  }
  0x4e   :  { %722 = vperm.xlu1 %1494, %v676_v12  }
  0x4f   :  { %717 = vperm.xlu0 %1493, %v675_v13  }
  0x52   :  { %812 = vperm.xlu1 %1494, %v694_v14  }
  0x53   :  { %807 = vperm.xlu0 %1493, %v693_v15  }
  0x56   :  { %732 = vperm.xlu1 %1494, %v678_v16  }
  0x57   :  { %727 = vperm.xlu0 %1493, %v677_v17  }
  0x5a   :  { %822 = vperm.xlu1 %1494, %v696_v18  }
  0x5b   :  { %817 = vperm.xlu0 %1493, %v695_v19  }
  0x5e   :  { %742 = vperm.xlu1 %1494, %v680_v20  }
  0x5f   :  { %737 = vperm.xlu0 %1493, %v679_v21  }
  0x62   :  { %832 = vperm.xlu1 %1494, %v698_v22  }
  0x63   :  { %827 = vperm.xlu0 %1493, %v697_v23  }
  0x66   :  { %752 = vperm.xlu1 %1494, %v682_v24  }
  0x67   :  { %747 = vperm.xlu0 %1493, %v681_v25  }
  0x6a   :  { %842 = vperm.xlu1 %1494, %v700_v27  }
  0x6b   :  { %837 = vperm.xlu0 %1493, %v699_v28  }
  0x6e   :  { %762 = vperm.xlu1 %1494, %v684_v29  }
  0x6f   :  { %757 = vperm.xlu0 %1493, %v683_v30  }
  0x72   :  { %852 = vperm.xlu1 %1494, %v702_v31  }
  0x73   :  { %847 = vperm.xlu0 %1493, %v701_v32  }
  0x76   :  { %772 = vperm.xlu1 %1494, %v686_v33  }
  0x77   :  { %767 = vperm.xlu0 %1493, %v685_v34  }
  0x7a   :  { %862 = vperm.xlu1 %1494, %v704_v35  }
  0x7b   :  { %857 = vperm.xlu0 %1493, %v703_v36  }
  0x7e   :  { %782 = vperm.xlu1 %1494, %v688_v37  }
  0x7f   :  { %777 = vperm.xlu0 %1493, %v687_v38  }
  0x81   :  { %v108_v42 = vpop.permute.xlu1 %107  ;;  %v98_v43 = vpop.permute.xlu0 %97 }
  0x83   :  { %1126 = vperm.xlu0 %1493, %v1123_v39  }
  0x85   :  { %v113_v44 = vpop.permute.xlu1 %112 }
  0x86   :  { %v103_v45 = vpop.permute.xlu0 %102 }
  0x89   :  { %v123_v46 = vpop.permute.xlu1 %122 }
  0x8a   :  { %v118_v47 = vpop.permute.xlu0 %117 }
  0x8d   :  { %v133_v48 = vpop.permute.xlu1 %132 }
  0x8e   :  { %v128_v49 = vpop.permute.xlu0 %127 }
  0x91   :  { %v143_v50 = vpop.permute.xlu1 %142 }
  0x92   :  { %v138_v51 = vpop.permute.xlu0 %137 }
  0x95   :  { %v153_v52 = vpop.permute.xlu1 %152 }
  0x96   :  { %v148_v54 = vpop.permute.xlu0 %147 }
  0x99   :  { %v163_v63 = vpop.permute.xlu1 %162 }
  0x9a   :  { %v158_v2 = vpop.permute.xlu0 %157 }
  0x9d   :  { %v173_v11 = vpop.permute.xlu1 %172 }
  0x9e   :  { %v168_v14 = vpop.permute.xlu0 %167 }
  0xa1   :  { %v183_v24 = vpop.permute.xlu1 %182 }
  0xa2   :  { %v178_v28 = vpop.permute.xlu0 %177 }
  0xa5   :  { %v193_v37 = vpop.permute.xlu1 %192 }
  0xa6   :  { %v188_v40 = vpop.permute.xlu0 %187 }
  0xde   :  { %v1329_v53 = vpop.f32.mrb[0].mxu0 }
  0xdf   :  { %v424_v55 = vadd.f32 %v1329_v53, %v103_v45  ;;  %v418_v56 = vpop.f32.mrb[1].mxu0  ;;  %v198_v53 = vpop.permute.xlu0 %197 }
  0xe0   :  { %v419_v57 = vadd.f32 %v418_v56, %v98_v43 }
  0xe1   :  { %v578_v58 = vmax.f32 %v424_v55, 0.0 }
  0xe2   :  { %v577_v59 = vmax.f32 %v419_v57, 0.0  ;;  %v1332_v60 = vpop.f32.mrb[2].mxu0 }
  0xe3   :  { %v434_v61 = vadd.f32 %v1332_v60, %v113_v44  ;;  %v428_v62 = vpop.f32.mrb[3].mxu0 }
  0xe4   :  { %v1380_v0 = vpack.c.bf16 %v578_v58, %v577_v59  ;;  %v429_v1 = vadd.f32 %v428_v62, %v108_v42 }
  0xe5   :  { %v580_v3 = vmax.f32 %v434_v61, 0.0 }
  0xe6   :  { %v579_v4 = vmax.f32 %v429_v1, 0.0  ;;  %v1335_v5 = vpop.f32.mrb[4].mxu0  ;;  %1381 = vmatpush1.bf16.msra.mxu0 %v1380_v0  ;;  %1475 = vmatpush1.bf16.msra.mxu1 %v1380_v0  ;;  %v208_v1 = vpop.permute.xlu0 %207 }
  0xe7   :  { %v444_v6 = vadd.f32 %v1335_v5, %v123_v46  ;;  %v438_v7 = vpop.f32.mrb[5].mxu0  ;;  %1382 = vmatprep.subr.bf16.mxu0 %v1496_v26  ;;  %1460 = vmatprep.subr.bf16.mxu1 %v1496_v26 }
  0xe8   :  { %v1383_v8 = vpack.c.bf16 %v580_v3, %v579_v4  ;;  %v439_v9 = vadd.f32 %v438_v7, %v118_v47 }
  0xe9   :  { %v582_v10 = vmax.f32 %v444_v6, 0.0 }
  0xea   :  { %v581_v12 = vmax.f32 %v439_v9, 0.0  ;;  %v1338_v13 = vpop.f32.mrb[6].mxu0  ;;  %1384 = vmatpush1.bf16.msra.mxu0 %v1383_v8  ;;  %1476 = vmatpush1.bf16.msra.mxu1 %v1383_v8 }
  0xeb   :  { %v454_v15 = vadd.f32 %v1338_v13, %v133_v48  ;;  %v448_v16 = vpop.f32.mrb[7].mxu0  ;;  %1385 = vmatprep.subr.bf16.mxu0 %v1496_v26  ;;  %1461 = vmatprep.subr.bf16.mxu1 %v1496_v26 }
  0xec   :  { %v1386_v17 = vpack.c.bf16 %v582_v10, %v581_v12  ;;  %v449_v18 = vadd.f32 %v448_v16, %v128_v49 }
  0xed   :  { %v584_v19 = vmax.f32 %v454_v15, 0.0 }
  0xee   :  { %v583_v20 = vmax.f32 %v449_v18, 0.0  ;;  %v1341_v21 = vpop.f32.mrb[8].mxu0  ;;  %1387 = vmatpush1.bf16.msra.mxu0 %v1386_v17  ;;  %1477 = vmatpush1.bf16.msra.mxu1 %v1386_v17 }
  0xef   :  { %v464_v22 = vadd.f32 %v1341_v21, %v143_v50  ;;  %v458_v23 = vpop.f32.mrb[9].mxu0  ;;  %1388 = vmatprep.subr.bf16.mxu0 %v1496_v26  ;;  %1462 = vmatprep.subr.bf16.mxu1 %v1496_v26  ;;  %v203_v50 = vpop.permute.xlu1 %202 }
  0xf0   :  { %v1389_v25 = vpack.c.bf16 %v584_v19, %v583_v20  ;;  %v459_v27 = vadd.f32 %v458_v23, %v138_v51 }
  0xf1   :  { %v586_v29 = vmax.f32 %v464_v22, 0.0 }
  0xf2   :  { %v585_v30 = vmax.f32 %v459_v27, 0.0  ;;  %v1344_v31 = vpop.f32.mrb[10].mxu0  ;;  %1390 = vmatpush1.bf16.msra.mxu0 %v1389_v25  ;;  %1478 = vmatpush1.bf16.msra.mxu1 %v1389_v25 }
  0xf3   :  { %v474_v32 = vadd.f32 %v1344_v31, %v153_v52  ;;  %v468_v33 = vpop.f32.mrb[11].mxu0  ;;  %1391 = vmatprep.subr.bf16.mxu0 %v1496_v26  ;;  %1463 = vmatprep.subr.bf16.mxu1 %v1496_v26  ;;  %v213_v62 = vpop.permute.xlu1 %212 }
  0xf4   :  { %v1392_v34 = vpack.c.bf16 %v586_v29, %v585_v30  ;;  %v469_v35 = vadd.f32 %v468_v33, %v148_v54 }
  0xf5   :  { %v588_v36 = vmax.f32 %v474_v32, 0.0 }
  0xf6   :  { %v587_v38 = vmax.f32 %v469_v35, 0.0  ;;  %v1347_v39 = vpop.f32.mrb[12].mxu0  ;;  %1393 = vmatpush1.bf16.msra.mxu0 %v1392_v34  ;;  %1479 = vmatpush1.bf16.msra.mxu1 %v1392_v34 }
  0xf7   :  { %v484_v41 = vadd.f32 %v1347_v39, %v163_v63  ;;  %v478_v42 = vpop.f32.mrb[13].mxu0  ;;  %1394 = vmatprep.subr.bf16.mxu0 %v1496_v26  ;;  %1464 = vmatprep.subr.bf16.mxu1 %v1496_v26 }
  0xf8   :  { %v1395_v43 = vpack.c.bf16 %v588_v36, %v587_v38  ;;  %v479_v44 = vadd.f32 %v478_v42, %v158_v2 }
  0xf9   :  { %v590_v45 = vmax.f32 %v484_v41, 0.0 }
  0xfa   :  { %v589_v46 = vmax.f32 %v479_v44, 0.0  ;;  %v1350_v47 = vpop.f32.mrb[14].mxu0  ;;  %1396 = vmatpush1.bf16.msra.mxu0 %v1395_v43  ;;  %1480 = vmatpush1.bf16.msra.mxu1 %v1395_v43 }
  0xfb   :  { %v494_v48 = vadd.f32 %v1350_v47, %v173_v11  ;;  %v488_v49 = vpop.f32.mrb[15].mxu0  ;;  %1397 = vmatprep.subr.bf16.mxu0 %v1496_v26  ;;  %1465 = vmatprep.subr.bf16.mxu1 %v1496_v26  ;;  %v223_v11 = vpop.permute.xlu1 %222 }
  0xfc   :  { %v1398_v51 = vpack.c.bf16 %v590_v45, %v589_v46  ;;  %v489_v52 = vadd.f32 %v488_v49, %v168_v14  ;;  %v218_v14 = vpop.permute.xlu0 %217 }
  0xfd   :  { %v592_v54 = vmax.f32 %v494_v48, 0.0 }
  0xfe   :  { %v591_v55 = vmax.f32 %v489_v52, 0.0  ;;  %v1353_v56 = vpop.f32.mrb[16].mxu0  ;;  %1399 = vmatpush1.bf16.msra.mxu0 %v1398_v51  ;;  %1481 = vmatpush1.bf16.msra.mxu1 %v1398_v51 }
  0xff   :  { %v504_v57 = vadd.f32 %v1353_v56, %v183_v24  ;;  %v498_v58 = vpop.f32.mrb[17].mxu0  ;;  %1400 = vmatprep.subr.bf16.mxu0 %v1496_v26  ;;  %1466 = vmatprep.subr.bf16.mxu1 %v1496_v26  ;;  %v233_v23 = vpop.permute.xlu1 %232 }
 0x100   :  { %v1401_v59 = vpack.c.bf16 %v592_v54, %v591_v55  ;;  %v499_v60 = vadd.f32 %v498_v58, %v178_v28  ;;  %v228_v27 = vpop.permute.xlu0 %227 }
 0x101   :  { %v594_v61 = vmax.f32 %v504_v57, 0.0 }
 0x102   :  { %v593_v63 = vmax.f32 %v499_v60, 0.0  ;;  %v1356_v0 = vpop.f32.mrb[18].mxu0  ;;  %1402 = vmatpush1.bf16.msra.mxu0 %v1401_v59  ;;  %1482 = vmatpush1.bf16.msra.mxu1 %v1401_v59  ;;  %v609_v60 = vld [vmem:[%s2190_s3] sm:$0xff] }
 0x103   :  { %v514_v2 = vadd.f32 %v1356_v0, %v193_v37  ;;  %v508_v3 = vpop.f32.mrb[19].mxu0  ;;  %1403 = vmatprep.subr.bf16.mxu0 %v1496_v26  ;;  %1467 = vmatprep.subr.bf16.mxu1 %v1496_v26  ;;  %v243_v37 = vpop.permute.xlu1 %242  ;;  %v639_v0 = vld [vmem:[%s2190_s3 + $0xf0] sm:$0xff] }
 0x104   :  { %v1404_v4 = vpack.c.bf16 %v594_v61, %v593_v63  ;;  %v509_v5 = vadd.f32 %v508_v3, %v188_v40  ;;  %v238_v40 = vpop.permute.xlu0 %237  ;;  %v637_v61 = vld [vmem:[%s2190_s3 + $0xe0] sm:$0xff]  ;;  %v640_v63 = vld [vmem:[%s2190_s3 + $0xf8] sm:$0xff] }
 0x105   :  { %v596_v6 = vmax.f32 %v514_v2, 0.0  ;;  %v642_v2 = vld [vmem:[%s2190_s3 + $0x108] sm:$0xff]  ;;  %v613_v3 = vld [vmem:[%s2190_s3 + $0x20] sm:$0xff] }
 0x106   :  { %v595_v7 = vmax.f32 %v509_v5, 0.0  ;;  %v1359_v8 = vpop.f32.mrb[20].mxu0  ;;  %1405 = vmatpush1.bf16.msra.mxu0 %v1404_v4  ;;  %1483 = vmatpush1.bf16.msra.mxu1 %v1404_v4  ;;  %v641_v4 = vld [vmem:[%s2190_s3 + $0x100] sm:$0xff]  ;;  %v616_v5 = vld [vmem:[%s2190_s3 + $0x38] sm:$0xff] }
 0x107   :  { %v524_v9 = vadd.f32 %v1359_v8, %v203_v50  ;;  %v518_v10 = vpop.f32.mrb[21].mxu0  ;;  %1406 = vmatprep.subr.bf16.mxu0 %v1496_v26  ;;  %1468 = vmatprep.subr.bf16.mxu1 %v1496_v26  ;;  %v253_v49 = vpop.permute.xlu1 %252  ;;  %v643_v8 = vld [vmem:[%s2190_s3 + $0x110] sm:$0xff] }
 0x108   :  { %v1407_v12 = vpack.c.bf16 %v596_v6, %v595_v7  ;;  %v519_v13 = vadd.f32 %v518_v10, %v198_v53  ;;  %v248_v52 = vpop.permute.xlu0 %247  ;;  %v644_v6 = vld [vmem:[%s2190_s3 + $0x118] sm:$0xff]  ;;  %v615_v7 = vld [vmem:[%s2190_s3 + $0x30] sm:$0xff]  ;;  %v646_v10 = vld [vmem:[%s2190_s3 + $0x128] sm:$0xff] }
 0x109   :  { %v598_v15 = vmax.f32 %v524_v9, 0.0  ;;  %v618_v9 = vld [vmem:[%s2190_s3 + $0x48] sm:$0xff] }
 0x10a   :  { %v597_v16 = vmax.f32 %v519_v13, 0.0  ;;  %v1362_v17 = vpop.f32.mrb[22].mxu0  ;;  %1408 = vmatpush1.bf16.msra.mxu0 %v1407_v12  ;;  %1484 = vmatpush1.bf16.msra.mxu1 %v1407_v12  ;;  %v645_v12 = vld [vmem:[%s2190_s3 + $0x120] sm:$0xff]  ;;  %v620_v13 = vld [vmem:[%s2190_s3 + $0x58] sm:$0xff] }
 0x10b   :  { %v534_v18 = vadd.f32 %v1362_v17, %v213_v62  ;;  %v528_v19 = vpop.f32.mrb[23].mxu0  ;;  %1409 = vmatprep.subr.bf16.mxu0 %v1496_v26  ;;  %1469 = vmatprep.subr.bf16.mxu1 %v1496_v26  ;;  %v612_v62 = vld [vmem:[%s2190_s3 + $0x18] sm:$0xff]  ;;  %v622_v17 = vld [vmem:[%s2190_s3 + $0x68] sm:$0xff] }
 0x10c   :  { %v1410_v20 = vpack.c.bf16 %v598_v15, %v597_v16  ;;  %v529_v21 = vadd.f32 %v528_v19, %v208_v1  ;;  %v614_v1 = vld [vmem:[%s2190_s3 + $0x28] sm:$0xff]  ;;  %v619_v15 = vld [vmem:[%s2190_s3 + $0x50] sm:$0xff]  ;;  %v621_v19 = vld [vmem:[%s2190_s3 + $0x60] sm:$0xff] }
 0x10d   :  { %v600_v22 = vmax.f32 %v534_v18, 0.0  ;;  %v647_v16 = vld [vmem:[%s2190_s3 + $0x130] sm:$0xff]  ;;  %v650_v18 = vld [vmem:[%s2190_s3 + $0x148] sm:$0xff] }
 0x10e   :  { %v599_v24 = vmax.f32 %v529_v21, 0.0  ;;  %v1365_v25 = vpop.f32.mrb[24].mxu0  ;;  %1411 = vmatpush1.bf16.msra.mxu0 %v1410_v20  ;;  %1485 = vmatpush1.bf16.msra.mxu1 %v1410_v20  ;;  %v649_v20 = vld [vmem:[%s2190_s3 + $0x140] sm:$0xff]  ;;  %v624_v21 = vld [vmem:[%s2190_s3 + $0x78] sm:$0xff] }
 0x10f   :  { %v544_v28 = vadd.f32 %v1365_v25, %v223_v11  ;;  %v538_v29 = vpop.f32.mrb[25].mxu0  ;;  %1412 = vmatprep.subr.bf16.mxu0 %v1496_v26  ;;  %1470 = vmatprep.subr.bf16.mxu1 %v1496_v26  ;;  %v617_v11 = vld [vmem:[%s2190_s3 + $0x40] sm:$0xff]  ;;  %v626_v25 = vld [vmem:[%s2190_s3 + $0x88] sm:$0xff] }
 0x110   :  { %v1413_v30 = vpack.c.bf16 %v600_v22, %v599_v24  ;;  %v539_v31 = vadd.f32 %v538_v29, %v218_v14  ;;  %v648_v14 = vld [vmem:[%s2190_s3 + $0x138] sm:$0xff]  ;;  %v651_v24 = vld [vmem:[%s2190_s3 + $0x150] sm:$0xff]  ;;  %v653_v29 = vld [vmem:[%s2190_s3 + $0x160] sm:$0xff] }
 0x111   :  { %v602_v32 = vmax.f32 %v544_v28, 0.0  ;;  %v652_v22 = vld [vmem:[%s2190_s3 + $0x158] sm:$0xff]  ;;  %v625_v28 = vld [vmem:[%s2190_s3 + $0x80] sm:$0xff] }
 0x112   :  { %v601_v33 = vmax.f32 %v539_v31, 0.0  ;;  %v1368_v34 = vpop.f32.mrb[26].mxu0  ;;  %1414 = vmatpush1.bf16.msra.mxu0 %v1413_v30  ;;  %1486 = vmatpush1.bf16.msra.mxu1 %v1413_v30  ;;  %v628_v30 = vld [vmem:[%s2190_s3 + $0x98] sm:$0xff] }
 0x113   :  { %v554_v35 = vadd.f32 %v1368_v34, %v233_v23  ;;  %v548_v36 = vpop.f32.mrb[27].mxu0  ;;  %1415 = vmatprep.subr.bf16.mxu0 %v1496_v26  ;;  %1471 = vmatprep.subr.bf16.mxu1 %v1496_v26  ;;  %v623_v23 = vld [vmem:[%s2190_s3 + $0x70] sm:$0xff]  ;;  %v656_v31 = vld [vmem:[%s2190_s3 + $0x178] sm:$0xff]  ;;  %v630_v34 = vld [vmem:[%s2190_s3 + $0xa8] sm:$0xff] }
 0x114   :  { %v1416_v38 = vpack.c.bf16 %v602_v32, %v601_v33  ;;  %v549_v39 = vadd.f32 %v548_v36, %v228_v27  ;;  %v654_v27 = vld [vmem:[%s2190_s3 + $0x168] sm:$0xff]  ;;  %v627_v32 = vld [vmem:[%s2190_s3 + $0x90] sm:$0xff]  ;;  %v629_v36 = vld [vmem:[%s2190_s3 + $0xa0] sm:$0xff] }
 0x115   :  { %v604_v41 = vmax.f32 %v554_v35, 0.0  ;;  %v655_v33 = vld [vmem:[%s2190_s3 + $0x170] sm:$0xff]  ;;  %v658_v35 = vld [vmem:[%s2190_s3 + $0x188] sm:$0xff] }
 0x116   :  { %v603_v42 = vmax.f32 %v549_v39, 0.0  ;;  %v1371_v43 = vpop.f32.mrb[28].mxu0  ;;  %1417 = vmatpush1.bf16.msra.mxu0 %v1416_v38  ;;  %1487 = vmatpush1.bf16.msra.mxu1 %v1416_v38  ;;  %v632_v38 = vld [vmem:[%s2190_s3 + $0xb8] sm:$0xff] }
 0x117   :  { %v564_v44 = vadd.f32 %v1371_v43, %v243_v37  ;;  %v558_v45 = vpop.f32.mrb[29].mxu0  ;;  %1418 = vmatprep.subr.bf16.mxu0 %v1496_v26  ;;  %1472 = vmatprep.subr.bf16.mxu1 %v1496_v26  ;;  %v657_v37 = vld [vmem:[%s2190_s3 + $0x180] sm:$0xff]  ;;  %v660_v39 = vld [vmem:[%s2190_s3 + $0x198] sm:$0xff]  ;;  %v662_v43 = vld [vmem:[%s2190_s3 + $0x1a8] sm:$0xff] }
 0x118   :  { %v1419_v46 = vpack.c.bf16 %v604_v41, %v603_v42  ;;  %v559_v47 = vadd.f32 %v558_v45, %v238_v40  ;;  %v631_v40 = vld [vmem:[%s2190_s3 + $0xb0] sm:$0xff]  ;;  %v634_v42 = vld [vmem:[%s2190_s3 + $0xc8] sm:$0xff]  ;;  %v661_v45 = vld [vmem:[%s2190_s3 + $0x1a0] sm:$0xff] }
 0x119   :  { %v606_v48 = vmax.f32 %v564_v44, 0.0  ;;  %v659_v41 = vld [vmem:[%s2190_s3 + $0x190] sm:$0xff]  ;;  %v633_v44 = vld [vmem:[%s2190_s3 + $0xc0] sm:$0xff] }
 0x11a   :  { %v605_v50 = vmax.f32 %v559_v47, 0.0  ;;  %v1374_v51 = vpop.f32.mrb[30].mxu0  ;;  %1420 = vmatpush1.bf16.msra.mxu0 %v1419_v46  ;;  %1488 = vmatpush1.bf16.msra.mxu1 %v1419_v46  ;;  %v636_v46 = vld [vmem:[%s2190_s3 + $0xd8] sm:$0xff] }
 0x11b   :  { %v574_v53 = vadd.f32 %v1374_v51, %v253_v49  ;;  %v568_v54 = vpop.f32.mrb[31].mxu0  ;;  %1421 = vmatprep.subr.bf16.mxu0 %v1496_v26  ;;  %1473 = vmatprep.subr.bf16.mxu1 %v1496_v26  ;;  %v664_v47 = vld [vmem:[%s2190_s3 + $0x1b8] sm:$0xff]  ;;  %v663_v49 = vld [vmem:[%s2190_s3 + $0x1b0] sm:$0xff]  ;;  %v665_v51 = vld [vmem:[%s2190_s3 + $0x1c0] sm:$0xff] }
 0x11c   :  { %v1422_v55 = vpack.c.bf16 %v606_v48, %v605_v50  ;;  %v569_v56 = vadd.f32 %v568_v54, %v248_v52  ;;  %v635_v48 = vld [vmem:[%s2190_s3 + $0xd0] sm:$0xff]  ;;  %v666_v50 = vld [vmem:[%s2190_s3 + $0x1c8] sm:$0xff]  ;;  %v668_v52 = vld [vmem:[%s2190_s3 + $0x1d8] sm:$0xff] }
 0x11d   :  { %v608_v57 = vmax.f32 %v574_v53, 0.0  ;;  %v667_v53 = vld [vmem:[%s2190_s3 + $0x1d0] sm:$0xff]  ;;  %v670_v54 = vld [vmem:[%s2190_s3 + $0x1e8] sm:$0xff] }
 0x11e   :  { %v607_v58 = vmax.f32 %v569_v56, 0.0  ;;  %1423 = vmatpush1.bf16.msra.mxu0 %v1422_v55  ;;  %1489 = vmatpush1.bf16.msra.mxu1 %v1422_v55  ;;  %v669_v55 = vld [vmem:[%s2190_s3 + $0x1e0] sm:$0xff]  ;;  %v672_v56 = vld [vmem:[%s2190_s3 + $0x1f8] sm:$0xff] }
 0x11f   :  { %1424 = vmatprep.subr.bf16.mxu0 %v1496_v26  ;;  %1474 = vmatprep.subr.bf16.mxu1 %v1496_v26  ;;  %v611_v26 = vld [vmem:[%s2190_s3 + $0x10] sm:$0xff] }
 0x120   :  { %v1425_v59 = vpack.c.bf16 %v608_v57, %v607_v58  ;;  %v671_v57 = vld [vmem:[%s2190_s3 + $0x1f0] sm:$0xff]  ;;  %v788_v58 = vpop.permute.xlu0 %787 }
 0x122   :  { %1426 = vmatpush1.bf16.msra.mxu0 %v1425_v59  ;;  %1490 = vmatpush1.bf16.msra.mxu1 %v1425_v59  ;;  %v2093_v59 = vpop.permute.xlu1 %792 }
 0x125   :  { %930 = vmatmul.mubr.f32.vlgmr.msra.gmra.mrb[32].mxu0 %v609_v60  ;;  %1000 = vmatmul.mubr.f32.vlgmr.msra.gmra.mrb[0].mxu1 %v637_v61  ;;  %v708_v60 = vpop.permute.xlu0 %707 }
 0x126   :  { %934 = vmatprep.mubr.f32.mxu0 %v612_v62  ;;  %1004 = vmatprep.mubr.f32.mxu1 %v640_v63  ;;  %v713_v61 = vpop.permute.xlu1 %712 }
 0x129   :  { %935 = vmatmul.mubr.f32.gmra.mrb[34].mxu0 %v611_v26  ;;  %1005 = vmatmul.mubr.f32.gmra.mrb[2].mxu1 %v639_v0  ;;  %v2095_v62 = vpop.permute.xlu0 %797 }
 0x12a   :  { %939 = vmatprep.mubr.f32.mxu0 %v614_v1  ;;  %1009 = vmatprep.mubr.f32.mxu1 %v642_v2  ;;  %v2097_v63 = vpop.permute.xlu1 %802 }
 0x12d   :  { %940 = vmatmul.mubr.f32.gmra.mrb[36].mxu0 %v613_v3  ;;  %1010 = vmatmul.mubr.f32.gmra.mrb[4].mxu1 %v641_v4  ;;  %v718_v26 = vpop.permute.xlu0 %717  ;;  %v1129_v3 = vlaneseq }
 0x12e   :  { %944 = vmatprep.mubr.f32.mxu0 %v616_v5  ;;  %1014 = vmatprep.mubr.f32.mxu1 %v644_v6  ;;  %v723_v0 = vpop.permute.xlu1 %722 }
 0x12f   :  { %v2107_v6 = vshrl.u32 %v1129_v3, 7 }
 0x131   :  { %945 = vmatmul.mubr.f32.gmra.mrb[38].mxu0 %v615_v7  ;;  %1015 = vmatmul.mubr.f32.gmra.mrb[6].mxu1 %v643_v8  ;;  %v2099_v1 = vpop.permute.xlu0 %807  ;;  %v2112_v7 = vld [vmem:[%s2191_s5] sm:$0x3]  ;;  %v1140_v8 = vsub.s32 1, %v2107_v6 }
 0x132   :  { %949 = vmatprep.mubr.f32.mxu0 %v618_v9  ;;  %1019 = vmatprep.mubr.f32.mxu1 %v646_v10  ;;  %v2101_v2 = vpop.permute.xlu1 %812 }
 0x133   :  { %v1141_v10 = vrot.slane %v2112_v7, %v1140_v8 }
 0x135   :  { %950 = vmatmul.mubr.f32.gmra.mrb[40].mxu0 %v617_v11  ;;  %1020 = vmatmul.mubr.f32.gmra.mrb[8].mxu1 %v645_v12  ;;  %v2103_v4 = vpop.permute.xlu0 %727 }
 0x136   :  { %954 = vmatprep.mubr.f32.mxu0 %v620_v13  ;;  %1024 = vmatprep.mubr.f32.mxu1 %v648_v14  ;;  %v2105_v5 = vpop.permute.xlu1 %732 }
 0x139   :  { %955 = vmatmul.mubr.f32.gmra.mrb[42].mxu0 %v619_v15  ;;  %1025 = vmatmul.mubr.f32.gmra.mrb[10].mxu1 %v647_v16  ;;  %v2115_v9 = vpop.permute.xlu0 %817 }
 0x13a   :  { %959 = vmatprep.mubr.f32.mxu0 %v622_v17  ;;  %1029 = vmatprep.mubr.f32.mxu1 %v650_v18  ;;  %v2118_v11 = vpop.permute.xlu1 %822 }
 0x13d   :  { %960 = vmatmul.mubr.f32.gmra.mrb[44].mxu0 %v621_v19  ;;  %1030 = vmatmul.mubr.f32.gmra.mrb[12].mxu1 %v649_v20  ;;  %v2120_v12 = vpop.permute.xlu0 %737 }
 0x13e   :  { %964 = vmatprep.mubr.f32.mxu0 %v624_v21  ;;  %1034 = vmatprep.mubr.f32.mxu1 %v652_v22  ;;  %v2122_v13 = vpop.permute.xlu1 %742 }
 0x141   :  { %965 = vmatmul.mubr.f32.gmra.mrb[46].mxu0 %v623_v23  ;;  %1035 = vmatmul.mubr.f32.gmra.mrb[14].mxu1 %v651_v24  ;;  %v2124_v14 = vpop.permute.xlu0 %827 }
 0x142   :  { %969 = vmatprep.mubr.f32.mxu0 %v626_v25  ;;  %1039 = vmatprep.mubr.f32.mxu1 %v654_v27  ;;  %v2126_v15 = vpop.permute.xlu1 %832 }
 0x145   :  { %970 = vmatmul.mubr.f32.gmra.mrb[48].mxu0 %v625_v28  ;;  %1040 = vmatmul.mubr.f32.gmra.mrb[16].mxu1 %v653_v29  ;;  %v2128_v16 = vpop.permute.xlu0 %747 }
 0x146   :  { %974 = vmatprep.mubr.f32.mxu0 %v628_v30  ;;  %1044 = vmatprep.mubr.f32.mxu1 %v656_v31  ;;  %v2130_v17 = vpop.permute.xlu1 %752 }
 0x149   :  { %975 = vmatmul.mubr.f32.gmra.mrb[50].mxu0 %v627_v32  ;;  %1045 = vmatmul.mubr.f32.gmra.mrb[18].mxu1 %v655_v33  ;;  %v2132_v18 = vpop.permute.xlu0 %837 }
 0x14a   :  { %979 = vmatprep.mubr.f32.mxu0 %v630_v34  ;;  %1049 = vmatprep.mubr.f32.mxu1 %v658_v35  ;;  %v2134_v19 = vpop.permute.xlu1 %842 }
 0x14d   :  { %980 = vmatmul.mubr.f32.gmra.mrb[52].mxu0 %v629_v36  ;;  %1050 = vmatmul.mubr.f32.gmra.mrb[20].mxu1 %v657_v37  ;;  %v2136_v20 = vpop.permute.xlu0 %757 }
 0x14e   :  { %984 = vmatprep.mubr.f32.mxu0 %v632_v38  ;;  %1054 = vmatprep.mubr.f32.mxu1 %v660_v39  ;;  %v2138_v21 = vpop.permute.xlu1 %762 }
 0x151   :  { %985 = vmatmul.mubr.f32.gmra.mrb[54].mxu0 %v631_v40  ;;  %1055 = vmatmul.mubr.f32.gmra.mrb[22].mxu1 %v659_v41  ;;  %v2140_v22 = vpop.permute.xlu0 %847 }
 0x152   :  { %989 = vmatprep.mubr.f32.mxu0 %v634_v42  ;;  %1059 = vmatprep.mubr.f32.mxu1 %v662_v43  ;;  %v2142_v23 = vpop.permute.xlu1 %852 }
 0x155   :  { %990 = vmatmul.mubr.f32.gmra.mrb[56].mxu0 %v633_v44  ;;  %1060 = vmatmul.mubr.f32.gmra.mrb[24].mxu1 %v661_v45  ;;  %v2144_v24 = vpop.permute.xlu0 %767 }
 0x156   :  { %994 = vmatprep.mubr.f32.mxu0 %v636_v46  ;;  %1064 = vmatprep.mubr.f32.mxu1 %v664_v47  ;;  %v2146_v25 = vpop.permute.xlu1 %772 }
 0x159   :  { %995 = vmatmul.mubr.f32.gmra.mrb[58].mxu0 %v635_v48  ;;  %1065 = vmatmul.mubr.f32.gmra.mrb[26].mxu1 %v663_v49  ;;  %v2148_v27 = vpop.permute.xlu0 %857 }
 0x15a   :  { %1069 = vmatprep.mubr.f32.mxu1 %v666_v50  ;;  %1208 = vmatprep.mubr.f32.mxu0 %v1141_v10  ;;  %v2150_v28 = vpop.permute.xlu1 %862 }
 0x15d   :  { %1070 = vmatmul.mubr.f32.gmra.mrb[28].mxu1 %v665_v51  ;;  %v778_v33 = vpop.permute.xlu0 %777 }
 0x15e   :  { %1074 = vmatprep.mubr.f32.mxu1 %v668_v52  ;;  %v783_v34 = vpop.permute.xlu1 %782 }
 0x161   :  { %1075 = vmatmul.mubr.f32.gmra.mrb[30].mxu1 %v667_v53 }
 0x162   :  { %1079 = vmatprep.mubr.f32.mxu1 %v670_v54 }
 0x165   :  { %1080 = vmatmul.mubr.f32.gmra.mrb[32].mxu1 %v669_v55 }
 0x166   :  { %1084 = vmatprep.mubr.f32.mxu1 %v672_v56 }
 0x169   :  { %1085 = vmatmul.mubr.f32.gmra.mrb[34].mxu1 %v671_v57 }
 0x1f8   :  { %v931_v29 = vpop.f32.mrb[32].mxu0  ;;  %v1001_v30 = vpop.f32.mrb[0].mxu1 }
 0x1f9   :  { %v1003_v31 = vpop.f32.mrb[1].mxu1  ;;  %v933_v32 = vpop.f32.mrb[33].mxu0  ;;  %v932_v35 = vadd.f32 %v931_v29, %v708_v60  ;;  %v1002_v36 = vadd.f32 %v1001_v30, %v778_v33 }
 0x1fb   :  { %v1090_v43 = vmax.f32 %v932_v35, 0.0  ;;  %v1104_v44 = vmax.f32 %v1002_v36, 0.0 }
 0x1fc   :  { %v936_v37 = vpop.f32.mrb[34].mxu0  ;;  %v1006_v38 = vpop.f32.mrb[2].mxu1 }
 0x1fd   :  { %v937_v39 = vadd.f32 %v936_v37, %v713_v61  ;;  %v1007_v40 = vadd.f32 %v1006_v38, %v783_v34  ;;  %v1008_v41 = vpop.f32.mrb[3].mxu1  ;;  %v938_v42 = vpop.f32.mrb[35].mxu0 }
 0x1ff   :  { %v1091_v45 = vmax.f32 %v937_v39, 0.0  ;;  %v1105_v46 = vmax.f32 %v1007_v40, 0.0 }
 0x200   :  { %v941_v47 = vpop.f32.mrb[36].mxu0  ;;  %v1011_v48 = vpop.f32.mrb[4].mxu1 }
 0x201   :  { %v1429_v49 = vpack.c.bf16 %v1091_v45, %v1090_v43  ;;  %v2152_v50 = vpack.c.bf16 %v1105_v46, %v1104_v44  ;;  %v1013_v51 = vpop.f32.mrb[5].mxu1  ;;  %v943_v52 = vpop.f32.mrb[37].mxu0  ;;  %v942_v53 = vadd.f32 %v941_v47, %v718_v26  ;;  %v1012_v54 = vadd.f32 %v1011_v48, %v788_v58 }
 0x203   :  { %v1092_v8 = vmax.f32 %v942_v53, 0.0  ;;  %v1106_v10 = vmax.f32 %v1012_v54, 0.0 }
 0x204   :  { %v946_v55 = vpop.f32.mrb[38].mxu0  ;;  %v1016_v56 = vpop.f32.mrb[6].mxu1 }
 0x205   :  { %v947_v57 = vadd.f32 %v946_v55, %v723_v0  ;;  %v1017_v60 = vadd.f32 %v1016_v56, %v2093_v59  ;;  %v1018_v61 = vpop.f32.mrb[7].mxu1  ;;  %v948_v3 = vpop.f32.mrb[39].mxu0 }
 0x207   :  { %v1093_v29 = vmax.f32 %v947_v57, 0.0  ;;  %v1107_v30 = vmax.f32 %v1017_v60, 0.0 }
 0x208   :  { %v951_v31 = vpop.f32.mrb[40].mxu0  ;;  %v1021_v32 = vpop.f32.mrb[8].mxu1 }
 0x209   :  { %v1433_v33 = vpack.c.bf16 %v1093_v29, %v1092_v8  ;;  %v1427_v34 = vpack.c.bf16 %v1107_v30, %v1106_v10  ;;  %v1023_v35 = vpop.f32.mrb[9].mxu1  ;;  %v953_v36 = vpop.f32.mrb[41].mxu0  ;;  %v952_v26 = vadd.f32 %v951_v31, %v2103_v4  ;;  %v1022_v58 = vadd.f32 %v1021_v32, %v2095_v62 }
 0x20b   :  { %1428 = vmatprep.subr.bf16.mxu0 %v1427_v34  ;;  %v1094_v41 = vmax.f32 %v952_v26, 0.0  ;;  %v1108_v42 = vmax.f32 %v1022_v58, 0.0 }
 0x20c   :  { %v956_v0 = vpop.f32.mrb[42].mxu0  ;;  %v1026_v37 = vpop.f32.mrb[10].mxu1  ;;  %1430 = vmatpush3.bf16.msra.mxu0 %v1429_v49 }
 0x20d   :  { %v957_v59 = vadd.f32 %v956_v0, %v2105_v5  ;;  %v1027_v38 = vadd.f32 %v1026_v37, %v2097_v63  ;;  %v1028_v39 = vpop.f32.mrb[11].mxu1  ;;  %v958_v40 = vpop.f32.mrb[43].mxu0 }
 0x20f   :  { %v1095_v43 = vmax.f32 %v957_v59, 0.0  ;;  %v1109_v44 = vmax.f32 %v1027_v38, 0.0 }
 0x210   :  { %v961_v45 = vpop.f32.mrb[44].mxu0  ;;  %v1031_v46 = vpop.f32.mrb[12].mxu1 }
 0x211   :  { %v1437_v47 = vpack.c.bf16 %v1095_v43, %v1094_v41  ;;  %v1431_v4 = vpack.c.bf16 %v1109_v44, %v1108_v42  ;;  %v1033_v48 = vpop.f32.mrb[13].mxu1  ;;  %v963_v62 = vpop.f32.mrb[45].mxu0  ;;  %v962_v51 = vadd.f32 %v961_v45, %v2120_v12  ;;  %v1032_v49 = vadd.f32 %v1031_v46, %v2099_v1 }
 0x213   :  { %1432 = vmatprep.subr.bf16.mxu0 %v1431_v4  ;;  %v1096_v56 = vmax.f32 %v962_v51, 0.0  ;;  %v1110_v57 = vmax.f32 %v1032_v49, 0.0 }
 0x214   :  { %v966_v5 = vpop.f32.mrb[46].mxu0  ;;  %v1036_v52 = vpop.f32.mrb[14].mxu1  ;;  %1434 = vmatpush3.bf16.msra.mxu0 %v1433_v33 }
 0x215   :  { %v967_v63 = vadd.f32 %v966_v5, %v2122_v13  ;;  %v1037_v53 = vadd.f32 %v1036_v52, %v2101_v2  ;;  %v1038_v54 = vpop.f32.mrb[15].mxu1  ;;  %v968_v55 = vpop.f32.mrb[47].mxu0 }
 0x217   :  { %v1097_v60 = vmax.f32 %v967_v63, 0.0  ;;  %v1111_v61 = vmax.f32 %v1037_v53, 0.0 }
 0x218   :  { %v971_v3 = vpop.f32.mrb[48].mxu0  ;;  %v1041_v8 = vpop.f32.mrb[16].mxu1 }
 0x219   :  { %v1441_v10 = vpack.c.bf16 %v1097_v60, %v1096_v56  ;;  %v1435_v12 = vpack.c.bf16 %v1111_v61, %v1110_v57  ;;  %v1043_v29 = vpop.f32.mrb[17].mxu1  ;;  %v973_v1 = vpop.f32.mrb[49].mxu0  ;;  %v972_v30 = vadd.f32 %v971_v3, %v2128_v16  ;;  %v1042_v31 = vadd.f32 %v1041_v8, %v2115_v9 }
 0x21b   :  { %1436 = vmatprep.subr.bf16.mxu0 %v1435_v12  ;;  %v1098_v36 = vmax.f32 %v972_v30, 0.0  ;;  %v1112_v26 = vmax.f32 %v1042_v31, 0.0 }
 0x21c   :  { %v976_v13 = vpop.f32.mrb[50].mxu0  ;;  %v1046_v32 = vpop.f32.mrb[18].mxu1  ;;  %1438 = vmatpush3.bf16.msra.mxu0 %v1437_v47 }
 0x21d   :  { %v977_v2 = vadd.f32 %v976_v13, %v2130_v17  ;;  %v1047_v33 = vadd.f32 %v1046_v32, %v2118_v11  ;;  %v1048_v34 = vpop.f32.mrb[19].mxu1  ;;  %v978_v35 = vpop.f32.mrb[51].mxu0 }
 0x21f   :  { %v1099_v58 = vmax.f32 %v977_v2, 0.0  ;;  %v1113_v0 = vmax.f32 %v1047_v33, 0.0 }
 0x220   :  { %v981_v37 = vpop.f32.mrb[52].mxu0  ;;  %v1051_v59 = vpop.f32.mrb[20].mxu1 }
 0x221   :  { %v1445_v38 = vpack.c.bf16 %v1099_v58, %v1098_v36  ;;  %v1439_v16 = vpack.c.bf16 %v1113_v0, %v1112_v26  ;;  %v1053_v39 = vpop.f32.mrb[21].mxu1  ;;  %v983_v9 = vpop.f32.mrb[53].mxu0  ;;  %v982_v40 = vadd.f32 %v981_v37, %v2136_v20  ;;  %v1052_v41 = vadd.f32 %v1051_v59, %v2124_v14 }
 0x222   :  { %v1131_v26 = vsub.s32 0, %v2107_v6  ;;  %v1127_v0 = vpop.permute.xlu0 %1126 }
 0x223   :  { %1440 = vmatprep.subr.bf16.mxu0 %v1439_v16  ;;  %v1100_v46 = vmax.f32 %v982_v40, 0.0  ;;  %v1114_v47 = vmax.f32 %v1052_v41, 0.0 }
 0x224   :  { %v986_v17 = vpop.f32.mrb[54].mxu0  ;;  %v1056_v42 = vpop.f32.mrb[22].mxu1  ;;  %1442 = vmatpush3.bf16.msra.mxu0 %v1441_v10  ;;  %v1132_v59 = vrot.slane %v1127_v0, %v1131_v26 }
 0x225   :  { %v987_v11 = vadd.f32 %v986_v17, %v2138_v21  ;;  %v1057_v43 = vadd.f32 %v1056_v42, %v2126_v15  ;;  %v1058_v44 = vpop.f32.mrb[23].mxu1  ;;  %v988_v45 = vpop.f32.mrb[55].mxu0 }
 0x227   :  { %v1101_v4 = vmax.f32 %v987_v11, 0.0  ;;  %v1115_v48 = vmax.f32 %v1057_v43, 0.0 }
 0x228   :  { %v991_v62 = vpop.f32.mrb[56].mxu0  ;;  %v1061_v51 = vpop.f32.mrb[24].mxu1 }
 0x229   :  { %v1449_v49 = vpack.c.bf16 %v1101_v4, %v1100_v46  ;;  %v1443_v20 = vpack.c.bf16 %v1115_v48, %v1114_v47  ;;  %v1063_v5 = vpop.f32.mrb[25].mxu1  ;;  %v993_v14 = vpop.f32.mrb[57].mxu0  ;;  %v992_v52 = vadd.f32 %v991_v62, %v2144_v24  ;;  %v1062_v63 = vadd.f32 %v1061_v51, %v2132_v18 }
 0x22b   :  { %1444 = vmatprep.subr.bf16.mxu0 %v1443_v20  ;;  %v1102_v57 = vmax.f32 %v992_v52, 0.0  ;;  %v1116_v60 = vmax.f32 %v1062_v63, 0.0 }
 0x22c   :  { %v996_v21 = vpop.f32.mrb[58].mxu0  ;;  %v1066_v53 = vpop.f32.mrb[26].mxu1  ;;  %1446 = vmatpush3.bf16.msra.mxu0 %v1445_v38 }
 0x22d   :  { %v997_v15 = vadd.f32 %v996_v21, %v2146_v25  ;;  %v1067_v54 = vadd.f32 %v1066_v53, %v2134_v19  ;;  %v1068_v55 = vpop.f32.mrb[27].mxu1  ;;  %v998_v56 = vpop.f32.mrb[59].mxu0 }
 0x22f   :  { %v1103_v61 = vmax.f32 %v997_v15, 0.0  ;;  %v1117_v3 = vmax.f32 %v1067_v54, 0.0 }
 0x230   :  { %v1071_v8 = vpop.f32.mrb[28].mxu1 }
 0x231   :  { %v1453_v10 = vpack.c.bf16 %v1103_v61, %v1102_v57  ;;  %v1447_v12 = vpack.c.bf16 %v1117_v3, %v1116_v60  ;;  %v1073_v24 = vpop.f32.mrb[29].mxu1  ;;  %v1072_v18 = vadd.f32 %v1071_v8, %v2140_v22 }
 0x233   :  { %1448 = vmatprep.subr.bf16.mxu0 %v1447_v12  ;;  %v1118_v30 = vmax.f32 %v1072_v18, 0.0 }
 0x234   :  { %v1076_v29 = vpop.f32.mrb[30].mxu1  ;;  %1450 = vmatpush3.bf16.msra.mxu0 %v1449_v49 }
 0x235   :  { %v1077_v1 = vadd.f32 %v1076_v29, %v2142_v23  ;;  %v1078_v25 = vpop.f32.mrb[31].mxu1  ;;  %v1137_v23 = vrot.slane %v2112_v7, %v1131_v26 }
 0x237   :  { %v1119_v19 = vmax.f32 %v1077_v1, 0.0 }
 0x238   :  { %v1081_v31 = vpop.f32.mrb[32].mxu1 }
 0x239   :  { %v1451_v13 = vpack.c.bf16 %v1119_v19, %v1118_v30  ;;  %v1083_v32 = vpop.f32.mrb[33].mxu1  ;;  %v1082_v2 = vadd.f32 %v1081_v31, %v2148_v27 }
 0x23b   :  { %1452 = vmatprep.subr.bf16.mxu0 %v1451_v13  ;;  %v1120_v22 = vmax.f32 %v1082_v2, 0.0 }
 0x23c   :  { %v1086_v33 = vpop.f32.mrb[34].mxu1  ;;  %1454 = vmatpush3.bf16.msra.mxu0 %v1453_v10 }
 0x23d   :  { %v1087_v34 = vadd.f32 %v1086_v33, %v2150_v28  ;;  %v1088_v35 = vpop.f32.mrb[35].mxu1 }
 0x23f   :  { %v1121_v36 = vmax.f32 %v1087_v34, 0.0 }
 0x241   :  { %v1455_v58 = vpack.c.bf16 %v1121_v36, %v1120_v22 }
 0x243   :  { %1456 = vmatprep.subr.bf16.mxu0 %v1455_v58 }
 0x244   :  { %1458 = vmatpush3.bf16.msra.mxu0 %v2152_v50 }
 0x247   :  { %1209 = vmatmul.mubr.f32.vlgmr.msra.gmra.mrb[60].mxu0 %v1137_v23 }
 0x31a   :  { %v1318_v37 = vpop.f32.mrb[60].mxu0 }
 0x31b   :  { %v1319_v27 = vpop.f32.mrb[61].mxu0 }
 0x31c   :  { %v1320_v38 = vadd.f32 %v1319_v27, %v1318_v37 }
 0x31e   :  { %v1211_v16 = vadd.f32 %v1320_v38, %v1132_v59 }
 0x320   :  { %1214 = vst [vmem:[%s2192_s7] sm:$0x1] %v1211_v16 }

</bundles_post_ra>
